<compile_context>
chip_gen: v6e
topology: v6e:2x2x1
jax: 0.10.0
libtpu: 0.0.40
codegen_flags: <defaults>
</compile_context>

<pallas_src>
import functools

import jax
import jax.numpy as jnp
from jax.experimental import pallas as pl
from jax.experimental.pallas import tpu as pltpu


F_PAD = 512  # 500 hidden features padded up to a lane-aligned width.


def _round_up(x, m):
    return ((x + m - 1) // m) * m


def _disc_kernel(x_ref, w1_ref, b1_ref, w2_ref, b2_ref, w3_ref, b3_ref, o_ref):
    x = x_ref[...]                                            # (TM, 2) f32

    # Layer 1: Linear(2, 512pad) + ReLU.  K=2 is far too shallow for the MXU,
    # so compute it as two broadcast FMAs on the VPU.
    w1 = w1_ref[...]                                          # (2, 512)
    h1 = x[:, 0:1] * w1[0:1, :] + x[:, 1:2] * w1[1:2, :] + b1_ref[...]
    h1 = jnp.maximum(h1, 0.0)                                 # (TM, 512)

    # Layer 2: Linear(512pad, 512pad) + ReLU on the MXU, f32 accumulation.
    h2 = jnp.dot(h1, w2_ref[...], preferred_element_type=jnp.float32)
    h2 = jnp.maximum(h2 + b2_ref[...], 0.0)                   # (TM, 512)

    # Layer 3: Linear(512pad, 2).
    logits = jnp.dot(h2, w3_ref[...], preferred_element_type=jnp.float32)
    logits = logits + b3_ref[...]                             # (TM, 2)

    # 2-class log-softmax, column-wise (numerically stable, VPU/EUP only).
    l0 = logits[:, 0:1]
    l1 = logits[:, 1:2]
    m = jnp.maximum(l0, l1)
    lse = m + jnp.log(jnp.exp(l0 - m) + jnp.exp(l1 - m))      # (TM, 1)
    o_ref[...] = (logits - lse).astype(o_ref.dtype)


@functools.partial(jax.jit, static_argnames=("tile_m",))
def discriminator_forward(x, padded_params, *, tile_m=256):
    """x: (N, 2) float32. Returns (N, 2) log-probabilities."""
    w1, b1, w2, b2, w3, b3 = padded_params
    n = x.shape[0]

    # Row tile: multiple of 8 sublanes, capped at MXU-height 256.
    tm = min(tile_m, _round_up(max(n, 1), 8))
    n_pad = _round_up(n, tm)
    if n_pad != n:
        x = jnp.pad(x, ((0, n_pad - n), (0, 0)))
    grid = (n_pad // tm,)

    def const_spec(arr):
        return pl.BlockSpec(arr.shape, lambda i: (0, 0))

    out = pl.pallas_call(
        _disc_kernel,
        out_shape=jax.ShapeDtypeStruct((n_pad, 2), jnp.float32),
        grid=grid,
        in_specs=[
            pl.BlockSpec((tm, 2), lambda i: (i, 0)),   # x: tiled over batch
            const_spec(w1), const_spec(b1),            # weights: VMEM-resident
            const_spec(w2), const_spec(b2),
            const_spec(w3), const_spec(b3),
        ],
        out_specs=pl.BlockSpec((tm, 2), lambda i: (i, 0)),
        compiler_params=pltpu.CompilerParams(
            dimension_semantics=("parallel",)),        # megacore on v7x
    )(x, w1, b1, w2, b2, w3, b3)
    return out[:n]


def init_params(key):
    """Deterministic init matching nn.Linear's default U(-1/sqrt(fan_in), ...).

    Returns logical (unpadded) params: weights stored (in_features, out_features).
    """
    ks = jax.random.split(key, 6)

    def lin(kw, kb, fan_in, fan_out):
        bound = 1.0 / jnp.sqrt(fan_in)
        w = jax.random.uniform(kw, (fan_in, fan_out), jnp.float32, -bound, bound)
        b = jax.random.uniform(kb, (1, fan_out), jnp.float32, -bound, bound)
        return w, b

    w1, b1 = lin(ks[0], ks[1], 2, 500)
    w2, b2 = lin(ks[2], ks[3], 500, 500)
    w3, b3 = lin(ks[4], ks[5], 500, 2)
    return (w1, b1, w2, b2, w3, b3)


def pad_params(params):
    """Zero-pad the 500-wide hidden dims to 512 for clean (8,128) layouts.

    Zeros are inert: ReLU(0)=0 and the padded rows/cols contribute nothing to
    the contractions; the final logits stay width 2 so the log-softmax
    normalizer is untouched.
    """
    w1, b1, w2, b2, w3, b3 = params
    p = F_PAD - 500
    w1p = jnp.pad(w1, ((0, 0), (0, p)))          # (2, 512)
    b1p = jnp.pad(b1, ((0, 0), (0, p)))          # (1, 512)
    w2p = jnp.pad(w2, ((0, p), (0, p)))          # (512, 512)
    b2p = jnp.pad(b2, ((0, 0), (0, p)))          # (1, 512)
    w3p = jnp.pad(w3, ((0, p), (0, 0)))          # (512, 2)
    return (w1p, b1p, w2p, b2p, w3p, b3)


def reference_forward(x, params):
    w1, b1, w2, b2, w3, b3 = params
    h1 = jnp.maximum(x @ w1 + b1, 0.0)
    h2 = jnp.maximum(h1 @ w2 + b2, 0.0)
    logits = h2 @ w3 + b3
    return jax.nn.log_softmax(logits, axis=-1)


if __name__ == "__main__":
    key = jax.random.PRNGKey(0)
    k_x, k_x2, k_p = jax.random.split(key, 3)

    params = init_params(k_p)
    padded = pad_params(params)

    # Small demo batch (fits a single tile).
    batch = 8
    x = jax.random.normal(k_x, (batch, 2), dtype=jnp.float32)
    out = jax.block_until_ready(discriminator_forward(x, padded))
    ref = reference_forward(x, params)
    assert out.shape == (batch, 2)
    assert jnp.allclose(out, ref, atol=1e-4, rtol=1e-4)

    # Larger, non-multiple-of-tile batch: exercises the grid + row padding.
    batch2 = 300
    x2 = jax.random.normal(k_x2, (batch2, 2), dtype=jnp.float32)
    out2 = jax.block_until_ready(discriminator_forward(x2, padded))
    ref2 = reference_forward(x2, params)
    assert out2.shape == (batch2, 2)
    assert jnp.allclose(out2, ref2, atol=1e-4, rtol=1e-4)

    print("KERNEL_OK")
</pallas_src>

<mosaic_0001>
module attributes {stable_mosaic.version = 11 : i64} {
  func.func @_disc_kernel(%arg0: i32, %arg1: memref<8x2xf32, #tpu.memory_space<vmem>>, %arg2: memref<2x512xf32, #tpu.memory_space<vmem>>, %arg3: memref<1x512xf32, #tpu.memory_space<vmem>>, %arg4: memref<512x512xf32, #tpu.memory_space<vmem>>, %arg5: memref<1x512xf32, #tpu.memory_space<vmem>>, %arg6: memref<512x2xf32, #tpu.memory_space<vmem>>, %arg7: memref<1x2xf32, #tpu.memory_space<vmem>>, %arg8: memref<8x2xf32, #tpu.memory_space<vmem>>) attributes {dimension_semantics = [#tpu.dimension_semantics<parallel>], iteration_bounds = array<i64: 1>, scalar_prefetch = 0 : i64, scratch_operands = 0 : i64, tpu.core_type = #tpu.core_type<tc>, window_params = [{transform_indices = @transform_0, window_bounds = array<i64: 8, 2>}, {pipeline_mode = #tpu.pipeline_mode<synchronous>, transform_indices = @transform_1, window_bounds = array<i64: 2, 512>}, {pipeline_mode = #tpu.pipeline_mode<synchronous>, transform_indices = @transform_2, window_bounds = array<i64: 1, 512>}, {pipeline_mode = #tpu.pipeline_mode<synchronous>, transform_indices = @transform_3, window_bounds = array<i64: 512, 512>}, {pipeline_mode = #tpu.pipeline_mode<synchronous>, transform_indices = @transform_4, window_bounds = array<i64: 1, 512>}, {pipeline_mode = #tpu.pipeline_mode<synchronous>, transform_indices = @transform_5, window_bounds = array<i64: 512, 2>}, {pipeline_mode = #tpu.pipeline_mode<synchronous>, transform_indices = @transform_6, window_bounds = array<i64: 1, 2>}, {transform_indices = @transform_7, window_bounds = array<i64: 8, 2>}]} {
    %c0 = arith.constant 0 : index
    %c0_0 = arith.constant 0 : index
    %0 = vector.load %arg1[%c0, %c0_0] : memref<8x2xf32, #tpu.memory_space<vmem>>, vector<8x2xf32>
    %c0_1 = arith.constant 0 : index
    %c0_2 = arith.constant 0 : index
    %1 = vector.load %arg2[%c0_1, %c0_2] : memref<2x512xf32, #tpu.memory_space<vmem>>, vector<2x512xf32>
    %2 = vector.extract_strided_slice %0 {offsets = [0, 0], sizes = [8, 1], strides = [1, 1]} : vector<8x2xf32> to vector<8x1xf32>
    %3 = vector.extract_strided_slice %1 {offsets = [0, 0], sizes = [1, 512], strides = [1, 1]} : vector<2x512xf32> to vector<1x512xf32>
    %4 = vector.broadcast %2 : vector<8x1xf32> to vector<8x512xf32>
    %5 = vector.broadcast %3 : vector<1x512xf32> to vector<8x512xf32>
    %6 = arith.mulf %4, %5 : vector<8x512xf32>
    %7 = vector.extract_strided_slice %0 {offsets = [0, 1], sizes = [8, 1], strides = [1, 1]} : vector<8x2xf32> to vector<8x1xf32>
    %8 = vector.extract_strided_slice %1 {offsets = [1, 0], sizes = [1, 512], strides = [1, 1]} : vector<2x512xf32> to vector<1x512xf32>
    %9 = vector.broadcast %7 : vector<8x1xf32> to vector<8x512xf32>
    %10 = vector.broadcast %8 : vector<1x512xf32> to vector<8x512xf32>
    %11 = arith.mulf %9, %10 : vector<8x512xf32>
    %12 = arith.addf %6, %11 : vector<8x512xf32>
    %c0_3 = arith.constant 0 : index
    %c0_4 = arith.constant 0 : index
    %13 = vector.load %arg3[%c0_3, %c0_4] : memref<1x512xf32, #tpu.memory_space<vmem>>, vector<1x512xf32>
    %14 = vector.broadcast %13 : vector<1x512xf32> to vector<8x512xf32>
    %15 = arith.addf %12, %14 : vector<8x512xf32>
    %cst = arith.constant 0.000000e+00 : f32
    %16 = vector.broadcast %cst : f32 to vector<8x512xf32>
    %17 = arith.maximumf %15, %16 : vector<8x512xf32>
    %c0_5 = arith.constant 0 : index
    %c0_6 = arith.constant 0 : index
    %18 = vector.load %arg4[%c0_5, %c0_6] : memref<512x512xf32, #tpu.memory_space<vmem>>, vector<512x512xf32>
    %cst_7 = arith.constant dense<0.000000e+00> : vector<8x512xf32>
    %19 = tpu.matmul %17, %18, %cst_7 {dimension_numbers = #tpu.dot_dimension_numbers<[1], [0], [0], [1], [0, 0, 1, 1], [], []>} : vector<8x512xf32>, vector<512x512xf32>, vector<8x512xf32> -> vector<8x512xf32>
    %c0_8 = arith.constant 0 : index
    %c0_9 = arith.constant 0 : index
    %20 = vector.load %arg5[%c0_8, %c0_9] : memref<1x512xf32, #tpu.memory_space<vmem>>, vector<1x512xf32>
    %21 = vector.broadcast %20 : vector<1x512xf32> to vector<8x512xf32>
    %22 = arith.addf %19, %21 : vector<8x512xf32>
    %cst_10 = arith.constant 0.000000e+00 : f32
    %23 = vector.broadcast %cst_10 : f32 to vector<8x512xf32>
    %24 = arith.maximumf %22, %23 : vector<8x512xf32>
    %c0_11 = arith.constant 0 : index
    %c0_12 = arith.constant 0 : index
    %25 = vector.load %arg6[%c0_11, %c0_12] : memref<512x2xf32, #tpu.memory_space<vmem>>, vector<512x2xf32>
    %cst_13 = arith.constant dense<0.000000e+00> : vector<8x2xf32>
    %26 = tpu.matmul %24, %25, %cst_13 {dimension_numbers = #tpu.dot_dimension_numbers<[1], [0], [0], [1], [0, 0, 1, 1], [], []>} : vector<8x512xf32>, vector<512x2xf32>, vector<8x2xf32> -> vector<8x2xf32>
    %c0_14 = arith.constant 0 : index
    %c0_15 = arith.constant 0 : index
    %27 = vector.load %arg7[%c0_14, %c0_15] : memref<1x2xf32, #tpu.memory_space<vmem>>, vector<1x2xf32>
    %28 = vector.broadcast %27 : vector<1x2xf32> to vector<8x2xf32>
    %29 = arith.addf %26, %28 : vector<8x2xf32>
    %30 = vector.extract_strided_slice %29 {offsets = [0, 0], sizes = [8, 1], strides = [1, 1]} : vector<8x2xf32> to vector<8x1xf32>
    %31 = vector.extract_strided_slice %29 {offsets = [0, 1], sizes = [8, 1], strides = [1, 1]} : vector<8x2xf32> to vector<8x1xf32>
    %32 = arith.maximumf %30, %31 : vector<8x1xf32>
    %33 = arith.subf %30, %32 : vector<8x1xf32>
    %34 = math.exp %33 : vector<8x1xf32>
    %35 = arith.subf %31, %32 : vector<8x1xf32>
    %36 = math.exp %35 : vector<8x1xf32>
    %37 = arith.addf %34, %36 : vector<8x1xf32>
    %38 = math.log %37 : vector<8x1xf32>
    %39 = arith.addf %32, %38 : vector<8x1xf32>
    %40 = vector.broadcast %39 : vector<8x1xf32> to vector<8x2xf32>
    %41 = arith.subf %29, %40 : vector<8x2xf32>
    %c0_16 = arith.constant 0 : index
    %c0_17 = arith.constant 0 : index
    %42 = vector.load %arg8[%c0_16, %c0_17] : memref<8x2xf32, #tpu.memory_space<vmem>>, vector<8x2xf32>
    tpu.vector_store %arg8[%c0_16, %c0_17], %41 {strides = array<i32>} : memref<8x2xf32, #tpu.memory_space<vmem>>, vector<8x2xf32>,
    return
  }
  func.func @transform_0(%arg0: i32) -> (i32, i32) {
    %c0_i32 = arith.constant 0 : i32
    %c0_i32_0 = arith.constant 0 : i32
    return %arg0, %c0_i32 : i32, i32
  }
  func.func @transform_1(%arg0: i32) -> (i32, i32) {
    %c0_i32 = arith.constant 0 : i32
    %c0_i32_0 = arith.constant 0 : i32
    %c0_i32_1 = arith.constant 0 : i32
    return %c0_i32, %c0_i32_0 : i32, i32
  }
  func.func @transform_2(%arg0: i32) -> (i32, i32) {
    %c0_i32 = arith.constant 0 : i32
    %c0_i32_0 = arith.constant 0 : i32
    %c0_i32_1 = arith.constant 0 : i32
    return %c0_i32, %c0_i32_0 : i32, i32
  }
  func.func @transform_3(%arg0: i32) -> (i32, i32) {
    %c0_i32 = arith.constant 0 : i32
    %c0_i32_0 = arith.constant 0 : i32
    %c0_i32_1 = arith.constant 0 : i32
    return %c0_i32, %c0_i32_0 : i32, i32
  }
  func.func @transform_4(%arg0: i32) -> (i32, i32) {
    %c0_i32 = arith.constant 0 : i32
    %c0_i32_0 = arith.constant 0 : i32
    %c0_i32_1 = arith.constant 0 : i32
    return %c0_i32, %c0_i32_0 : i32, i32
  }
  func.func @transform_5(%arg0: i32) -> (i32, i32) {
    %c0_i32 = arith.constant 0 : i32
    %c0_i32_0 = arith.constant 0 : i32
    %c0_i32_1 = arith.constant 0 : i32
    return %c0_i32, %c0_i32_0 : i32, i32
  }
  func.func @transform_6(%arg0: i32) -> (i32, i32) {
    %c0_i32 = arith.constant 0 : i32
    %c0_i32_0 = arith.constant 0 : i32
    %c0_i32_1 = arith.constant 0 : i32
    return %c0_i32, %c0_i32_0 : i32, i32
  }
  func.func @transform_7(%arg0: i32) -> (i32, i32) {
    %c0_i32 = arith.constant 0 : i32
    %c0_i32_0 = arith.constant 0 : i32
    return %arg0, %c0_i32 : i32, i32
  }
}

</mosaic_0001>

<bundles_post_ra>
// kernel: discriminator_forward.1
= control target key start
LH: loop header
LB: loop body
LE: loop exit
PB: predicated region body
PF: predicated region fallthrough
CT: control target
= control target key end

     0   :  { %12 = vsyncpa [#allocation3], 0  ;;  %s1088_s24 = smov [#allocation2]   ;;  %s1392_s0 = inlined_call_operand.vmem [shape: f32[8,2], index: 0, kind: input, shape index: {}]   ;;  %s1393_s1 = inlined_call_operand.vmem [shape: f32[2,512], index: 1, kind: input, shape index: {}]   ;;  %s1394_s2 = inlined_call_operand.vmem [shape: f32[1,512], index: 2, kind: input, shape index: {}]   ;;  %s1395_s3 = inlined_call_operand.hbm [shape: f32[512,512], index: 3, kind: input, shape index: {}]   ;;  %s1396_s4 = inlined_call_operand.vmem [shape: f32[1,512], index: 4, kind: input, shape index: {}]   ;;  %s1397_s5 = inlined_call_operand.vmem [shape: f32[512,2], index: 5, kind: input, shape index: {}]   ;;  %s1398_s6 = inlined_call_operand.vmem [shape: f32[1,2], index: 6, kind: input, shape index: {}]   ;;  %s1399_s7 = inlined_call_operand.vmem [shape: f32[8,2], index: 7, kind: output, shape index: {}]  }
   0x1   :  { %s24_s25 = sshll.u32 %s1088_s24, 4  ;;  %s25_s25 = int_to_ptr.vmem [resolvable:$true] %s24_s25 }
   0x2   :  { %s1074_s26 = scalar_lea.vmem %s25_s25, 32768  ;;  %p1079_p1 = scmp.lt.s32.totalorder %s25_s25, %s25_s25 }
   0x3   :  { %p1075_p0 = scmp.ne.s32.totalorder %s25_s25, %s1074_s26  ;;  %p1080_p2 = scmp.lt.s32.totalorder %s1074_s26, %s1074_s26 }
   0x5   :  { %p1081_p3 = por %p1080_p2, %p1079_p1 }
   0x7   :  { %p1082_p4 = pnand %p1081_p3, %p1075_p0 }
   0x9   :  { %1085 = shalt.err (!%p1082_p4)
}
   0xa   :  { %s1089_s27 = smov 512   ;;  %s1090_s28 = smov 32  }
   0xb   :  { %30 = dma.hbm_to_vmem [thread:$0]  %s1395_s3, 32768, %s25_s25, [#allocation3], %s1089_s27, %s1089_s27, %s1090_s28  }
   0xc   :  { %1086 = dma.done.wait [#allocation3], 32768  }
   0xd   :  { %1087 = vsyncadd [#allocation3], 4294934528  ;;  %v1091_v0 = vmov 0   ;;  %v40_v1 = vld [vmem:[%s1392_s0] sm:$0xff]  ;;  %v227_v2 = vld [vmem:[#allocation2 + $0x1e8] sm:$0xff]  ;;  %v1092_v13 = vmov 1  }
   0xe   :  { %1057 = vset.pattern.permute.xlu0 %v1091_v0  ;;  %v355_v3 = vld [vmem:[#allocation2 + $0x5e8] sm:$0xff]  ;;  %444 = vmatprep.subr.mxu0 %v227_v2  ;;  %v226_v4 = vld [vmem:[#allocation2 + $0x1e0] sm:$0xff]  ;;  %s1093_s9 = smov 127   ;;  %s1094_s0 = smov 1   ;;  %vm972_vm0 = vcmask 15360  }
   0xf   :  { %44 = vperm.xlu0 %1057, %v40_v1   ;;  %v354_v5 = vld [vmem:[#allocation2 + $0x5e0] sm:$0xff]  ;;  %v223_v6 = vld [vmem:[#allocation2 + $0x1c8] sm:$0xff]  ;;  %515 = vmatprep.subr.mxu1 %v355_v3 }
  0x10   :  { %445 = vmatpush1.msra.mxu0 %v226_v4  ;;  %v351_v7 = vld [vmem:[#allocation2 + $0x5c8] sm:$0xff]  ;;  %v222_v8 = vld [vmem:[#allocation2 + $0x1c0] sm:$0xff]  ;;  %516 = vmatpush1.msra.mxu1 %v354_v5 }
  0x11   :  { %v350_v9 = vld [vmem:[#allocation2 + $0x5c0] sm:$0xff]  ;;  %446 = vmatprep.subr.mxu0 %v223_v6  ;;  %v219_v10 = vld [vmem:[#allocation2 + $0x1a8] sm:$0xff]  ;;  %517 = vmatprep.subr.mxu1 %v351_v7 }
  0x12   :  { %447 = vmatpush1.msra.mxu0 %v222_v8  ;;  %v347_v11 = vld [vmem:[#allocation2 + $0x5a8] sm:$0xff]  ;;  %v218_v12 = vld [vmem:[#allocation2 + $0x1a0] sm:$0xff]  ;;  %518 = vmatpush1.msra.mxu1 %v350_v9 }
  0x13   :  { %1058 = vset.pattern.permute.xlu0 %v1092_v13  ;;  %v346_v14 = vld [vmem:[#allocation2 + $0x5a0] sm:$0xff]  ;;  %v215_v15 = vld [vmem:[#allocation2 + $0x188] sm:$0xff]  ;;  %448 = vmatprep.subr.mxu0 %v219_v10 }
  0x14   :  { %89 = vperm.xlu0 %1058, %v40_v1   ;;  %v343_v16 = vld [vmem:[#allocation2 + $0x588] sm:$0xff]  ;;  %v214_v17 = vld [vmem:[#allocation2 + $0x180] sm:$0xff]  ;;  %519 = vmatprep.subr.mxu1 %v347_v11 }
  0x15   :  { %449 = vmatpush1.msra.mxu0 %v218_v12  ;;  %v342_v18 = vld [vmem:[#allocation2 + $0x580] sm:$0xff]  ;;  %v211_v19 = vld [vmem:[#allocation2 + $0x168] sm:$0xff]  ;;  %520 = vmatpush1.msra.mxu1 %v346_v14 }
  0x16   :  { %450 = vmatprep.subr.mxu0 %v215_v15  ;;  %v339_v20 = vld [vmem:[#allocation2 + $0x568] sm:$0xff]  ;;  %v210_v21 = vld [vmem:[#allocation2 + $0x160] sm:$0xff]  ;;  %521 = vmatprep.subr.mxu1 %v343_v16 }
  0x17   :  { %451 = vmatpush1.msra.mxu0 %v214_v17  ;;  %v338_v22 = vld [vmem:[#allocation2 + $0x560] sm:$0xff]  ;;  %v207_v23 = vld [vmem:[#allocation2 + $0x148] sm:$0xff]  ;;  %522 = vmatpush1.msra.mxu1 %v342_v18 }
  0x18   :  { %452 = vmatprep.subr.mxu0 %v211_v19  ;;  %v335_v24 = vld [vmem:[#allocation2 + $0x548] sm:$0xff]  ;;  %v206_v25 = vld [vmem:[#allocation2 + $0x140] sm:$0xff]  ;;  %523 = vmatprep.subr.mxu1 %v339_v20 }
  0x19   :  { %453 = vmatpush1.msra.mxu0 %v210_v21  ;;  %v334_v26 = vld [vmem:[#allocation2 + $0x540] sm:$0xff]  ;;  %v203_v27 = vld [vmem:[#allocation2 + $0x128] sm:$0xff]  ;;  %524 = vmatpush1.msra.mxu1 %v338_v22 }
  0x1a   :  { %454 = vmatprep.subr.mxu0 %v207_v23  ;;  %v331_v28 = vld [vmem:[#allocation2 + $0x528] sm:$0xff]  ;;  %v202_v29 = vld [vmem:[#allocation2 + $0x120] sm:$0xff]  ;;  %525 = vmatprep.subr.mxu1 %v335_v24 }
  0x1b   :  { %455 = vmatpush1.msra.mxu0 %v206_v25  ;;  %v330_v30 = vld [vmem:[#allocation2 + $0x520] sm:$0xff]  ;;  %v199_v31 = vld [vmem:[#allocation2 + $0x108] sm:$0xff]  ;;  %526 = vmatpush1.msra.mxu1 %v334_v26 }
  0x1c   :  { %456 = vmatprep.subr.mxu0 %v203_v27  ;;  %v327_v32 = vld [vmem:[#allocation2 + $0x508] sm:$0xff]  ;;  %v198_v33 = vld [vmem:[#allocation2 + $0x100] sm:$0xff]  ;;  %527 = vmatprep.subr.mxu1 %v331_v28 }
  0x1d   :  { %457 = vmatpush1.msra.mxu0 %v202_v29  ;;  %v326_v34 = vld [vmem:[#allocation2 + $0x500] sm:$0xff]  ;;  %v195_v35 = vld [vmem:[#allocation2 + $0xe8] sm:$0xff]  ;;  %528 = vmatpush1.msra.mxu1 %v330_v30 }
  0x1e   :  { %458 = vmatprep.subr.mxu0 %v199_v31  ;;  %v323_v36 = vld [vmem:[#allocation2 + $0x4e8] sm:$0xff]  ;;  %v194_v37 = vld [vmem:[#allocation2 + $0xe0] sm:$0xff]  ;;  %529 = vmatprep.subr.mxu1 %v327_v32 }
  0x1f   :  { %459 = vmatpush1.msra.mxu0 %v198_v33  ;;  %v322_v38 = vld [vmem:[#allocation2 + $0x4e0] sm:$0xff]  ;;  %v191_v39 = vld [vmem:[#allocation2 + $0xc8] sm:$0xff]  ;;  %530 = vmatpush1.msra.mxu1 %v326_v34 }
  0x20   :  { %460 = vmatprep.subr.mxu0 %v195_v35  ;;  %v319_v40 = vld [vmem:[#allocation2 + $0x4c8] sm:$0xff]  ;;  %v190_v41 = vld [vmem:[#allocation2 + $0xc0] sm:$0xff]  ;;  %531 = vmatprep.subr.mxu1 %v323_v36 }
  0x21   :  { %461 = vmatpush1.msra.mxu0 %v194_v37  ;;  %v318_v42 = vld [vmem:[#allocation2 + $0x4c0] sm:$0xff]  ;;  %v187_v43 = vld [vmem:[#allocation2 + $0xa8] sm:$0xff]  ;;  %532 = vmatpush1.msra.mxu1 %v322_v38 }
  0x22   :  { %462 = vmatprep.subr.mxu0 %v191_v39  ;;  %v315_v44 = vld [vmem:[#allocation2 + $0x4a8] sm:$0xff]  ;;  %v186_v45 = vld [vmem:[#allocation2 + $0xa0] sm:$0xff]  ;;  %533 = vmatprep.subr.mxu1 %v319_v40 }
  0x23   :  { %463 = vmatpush1.msra.mxu0 %v190_v41  ;;  %v314_v46 = vld [vmem:[#allocation2 + $0x4a0] sm:$0xff]  ;;  %v183_v47 = vld [vmem:[#allocation2 + $0x88] sm:$0xff]  ;;  %534 = vmatpush1.msra.mxu1 %v318_v42 }
  0x24   :  { %464 = vmatprep.subr.mxu0 %v187_v43  ;;  %v311_v48 = vld [vmem:[#allocation2 + $0x488] sm:$0xff]  ;;  %v182_v49 = vld [vmem:[#allocation2 + $0x80] sm:$0xff]  ;;  %535 = vmatprep.subr.mxu1 %v315_v44 }
  0x25   :  { %465 = vmatpush1.msra.mxu0 %v186_v45  ;;  %v310_v50 = vld [vmem:[#allocation2 + $0x480] sm:$0xff]  ;;  %v179_v51 = vld [vmem:[#allocation2 + $0x68] sm:$0xff]  ;;  %536 = vmatpush1.msra.mxu1 %v314_v46 }
  0x26   :  { %466 = vmatprep.subr.mxu0 %v183_v47  ;;  %v307_v52 = vld [vmem:[#allocation2 + $0x468] sm:$0xff]  ;;  %v178_v53 = vld [vmem:[#allocation2 + $0x60] sm:$0xff]  ;;  %537 = vmatprep.subr.mxu1 %v311_v48 }
  0x27   :  { %467 = vmatpush1.msra.mxu0 %v182_v49  ;;  %v306_v54 = vld [vmem:[#allocation2 + $0x460] sm:$0xff]  ;;  %v175_v55 = vld [vmem:[#allocation2 + $0x48] sm:$0xff]  ;;  %538 = vmatpush1.msra.mxu1 %v310_v50 }
  0x28   :  { %468 = vmatprep.subr.mxu0 %v179_v51  ;;  %v303_v56 = vld [vmem:[#allocation2 + $0x448] sm:$0xff]  ;;  %v174_v57 = vld [vmem:[#allocation2 + $0x40] sm:$0xff]  ;;  %539 = vmatprep.subr.mxu1 %v307_v52 }
  0x29   :  { %469 = vmatpush1.msra.mxu0 %v178_v53  ;;  %v302_v58 = vld [vmem:[#allocation2 + $0x440] sm:$0xff]  ;;  %v171_v59 = vld [vmem:[#allocation2 + $0x28] sm:$0xff]  ;;  %540 = vmatpush1.msra.mxu1 %v306_v54 }
  0x2a   :  { %470 = vmatprep.subr.mxu0 %v175_v55  ;;  %v299_v60 = vld [vmem:[#allocation2 + $0x428] sm:$0xff]  ;;  %v170_v61 = vld [vmem:[#allocation2 + $0x20] sm:$0xff]  ;;  %541 = vmatprep.subr.mxu1 %v303_v56 }
  0x2b   :  { %471 = vmatpush1.msra.mxu0 %v174_v57  ;;  %v298_v62 = vld [vmem:[#allocation2 + $0x420] sm:$0xff]  ;;  %v167_v63 = vld [vmem:[#allocation2 + $0x8] sm:$0xff]  ;;  %542 = vmatpush1.msra.mxu1 %v302_v58 }
  0x2c   :  { %472 = vmatprep.subr.mxu0 %v171_v59  ;;  %v295_v1 = vld [vmem:[#allocation2 + $0x408] sm:$0xff]  ;;  %v166_v2 = vld [vmem:[#allocation2] sm:$0xff]  ;;  %543 = vmatprep.subr.mxu1 %v299_v60 }
  0x2d   :  { %473 = vmatpush1.msra.mxu0 %v170_v61  ;;  %v294_v3 = vld [vmem:[#allocation2 + $0x400] sm:$0xff]  ;;  %v291_v4 = vld [vmem:[#allocation2 + $0x3e8] sm:$0xff]  ;;  %544 = vmatpush1.msra.mxu1 %v298_v62 }
  0x2e   :  { %474 = vmatprep.subr.mxu0 %v167_v63  ;;  %v419_v5 = vld [vmem:[#allocation2 + $0x7e8] sm:$0xff]  ;;  %v290_v6 = vld [vmem:[#allocation2 + $0x3e0] sm:$0xff]  ;;  %545 = vmatprep.subr.mxu1 %v295_v1 }
  0x2f   :  { %475 = vmatpush1.msra.mxu0 %v166_v2  ;;  %v418_v7 = vld [vmem:[#allocation2 + $0x7e0] sm:$0xff]  ;;  %v287_v8 = vld [vmem:[#allocation2 + $0x3c8] sm:$0xff]  ;;  %546 = vmatpush1.msra.mxu1 %v294_v3 }
  0x30   :  { %476 = vmatprep.subr.mxu0 %v291_v4  ;;  %v415_v9 = vld [vmem:[#allocation2 + $0x7c8] sm:$0xff]  ;;  %v286_v10 = vld [vmem:[#allocation2 + $0x3c0] sm:$0xff]  ;;  %547 = vmatprep.subr.mxu1 %v419_v5  ;;  %v229_v5 = vld [vmem:[#allocation2 + $0x1f8] sm:$0xff] }
  0x31   :  { %477 = vmatpush2.msra.mxu0 %v290_v6  ;;  %v414_v11 = vld [vmem:[#allocation2 + $0x7c0] sm:$0xff]  ;;  %v283_v12 = vld [vmem:[#allocation2 + $0x3a8] sm:$0xff]  ;;  %548 = vmatpush2.msra.mxu1 %v418_v7  ;;  %v357_v6 = vld [vmem:[#allocation2 + $0x5f8] sm:$0xff]  ;;  %v48_v7 = vlaneseq }
  0x32   :  { %478 = vmatprep.subr.mxu0 %v287_v8  ;;  %v411_v13 = vld [vmem:[#allocation2 + $0x7a8] sm:$0xff]  ;;  %v282_v14 = vld [vmem:[#allocation2 + $0x3a0] sm:$0xff]  ;;  %549 = vmatprep.subr.mxu1 %v415_v9 }
  0x33   :  { %479 = vmatpush2.msra.mxu0 %v286_v10  ;;  %v410_v15 = vld [vmem:[#allocation2 + $0x7a0] sm:$0xff]  ;;  %v279_v16 = vld [vmem:[#allocation2 + $0x388] sm:$0xff]  ;;  %550 = vmatpush2.msra.mxu1 %v414_v11  ;;  %v49_v8 = vshrl.u32 %v48_v7, 7  ;;  %v217_v7 = vld [vmem:[#allocation2 + $0x198] sm:$0xff] }
  0x34   :  { %480 = vmatprep.subr.mxu0 %v283_v12  ;;  %v407_v17 = vld [vmem:[#allocation2 + $0x788] sm:$0xff]  ;;  %v278_v18 = vld [vmem:[#allocation2 + $0x380] sm:$0xff]  ;;  %551 = vmatprep.subr.mxu1 %v411_v13 }
  0x35   :  { %481 = vmatpush2.msra.mxu0 %v282_v14  ;;  %v406_v19 = vld [vmem:[#allocation2 + $0x780] sm:$0xff]  ;;  %v275_v20 = vld [vmem:[#allocation2 + $0x368] sm:$0xff]  ;;  %552 = vmatpush2.msra.mxu1 %v410_v15  ;;  %v1143_v9 = vsub.s32 0, %v49_v8  ;;  %v1145_v10 = vsub.s32 2, %v49_v8  ;;  %v58_v11 = vsub.s32 4, %v49_v8  ;;  %v62_v12 = vsub.s32 6, %v49_v8 }
  0x36   :  { %482 = vmatprep.subr.mxu0 %v279_v16  ;;  %v403_v21 = vld [vmem:[#allocation2 + $0x768] sm:$0xff]  ;;  %v274_v22 = vld [vmem:[#allocation2 + $0x360] sm:$0xff]  ;;  %553 = vmatprep.subr.mxu1 %v407_v17  ;;  %v1150_v14 = vsub.s32 1, %v49_v8  ;;  %v1152_v15 = vsub.s32 3, %v49_v8  ;;  %v102_v16 = vsub.s32 5, %v49_v8  ;;  %v106_v17 = vsub.s32 7, %v49_v8 }
  0x37   :  { %483 = vmatpush2.msra.mxu0 %v278_v18  ;;  %v402_v23 = vld [vmem:[#allocation2 + $0x760] sm:$0xff]  ;;  %v271_v24 = vld [vmem:[#allocation2 + $0x348] sm:$0xff]  ;;  %554 = vmatpush2.msra.mxu1 %v406_v19  ;;  %v345_v8 = vld [vmem:[#allocation2 + $0x598] sm:$0xff] }
  0x38   :  { %484 = vmatprep.subr.mxu0 %v275_v20  ;;  %v399_v25 = vld [vmem:[#allocation2 + $0x748] sm:$0xff]  ;;  %v270_v26 = vld [vmem:[#allocation2 + $0x340] sm:$0xff]  ;;  %555 = vmatprep.subr.mxu1 %v403_v21 }
  0x39   :  { %485 = vmatpush2.msra.mxu0 %v274_v22  ;;  %v398_v27 = vld [vmem:[#allocation2 + $0x740] sm:$0xff]  ;;  %v267_v28 = vld [vmem:[#allocation2 + $0x328] sm:$0xff]  ;;  %556 = vmatpush2.msra.mxu1 %v402_v23 }
  0x3a   :  { %486 = vmatprep.subr.mxu0 %v271_v24  ;;  %v395_v29 = vld [vmem:[#allocation2 + $0x728] sm:$0xff]  ;;  %v266_v30 = vld [vmem:[#allocation2 + $0x320] sm:$0xff]  ;;  %557 = vmatprep.subr.mxu1 %v399_v25 }
  0x3b   :  { %487 = vmatpush2.msra.mxu0 %v270_v26  ;;  %v394_v31 = vld [vmem:[#allocation2 + $0x720] sm:$0xff]  ;;  %v263_v32 = vld [vmem:[#allocation2 + $0x308] sm:$0xff]  ;;  %558 = vmatpush2.msra.mxu1 %v398_v27 }
  0x3c   :  { %488 = vmatprep.subr.mxu0 %v267_v28  ;;  %v391_v33 = vld [vmem:[#allocation2 + $0x708] sm:$0xff]  ;;  %v262_v34 = vld [vmem:[#allocation2 + $0x300] sm:$0xff]  ;;  %559 = vmatprep.subr.mxu1 %v395_v29 }
  0x3d   :  { %489 = vmatpush2.msra.mxu0 %v266_v30  ;;  %v390_v35 = vld [vmem:[#allocation2 + $0x700] sm:$0xff]  ;;  %v259_v36 = vld [vmem:[#allocation2 + $0x2e8] sm:$0xff]  ;;  %560 = vmatpush2.msra.mxu1 %v394_v31 }
  0x3e   :  { %490 = vmatprep.subr.mxu0 %v263_v32  ;;  %v387_v37 = vld [vmem:[#allocation2 + $0x6e8] sm:$0xff]  ;;  %v258_v38 = vld [vmem:[#allocation2 + $0x2e0] sm:$0xff]  ;;  %561 = vmatprep.subr.mxu1 %v391_v33 }
  0x3f   :  { %491 = vmatpush2.msra.mxu0 %v262_v34  ;;  %v386_v39 = vld [vmem:[#allocation2 + $0x6e0] sm:$0xff]  ;;  %v255_v40 = vld [vmem:[#allocation2 + $0x2c8] sm:$0xff]  ;;  %562 = vmatpush2.msra.mxu1 %v390_v35 }
  0x40   :  { %492 = vmatprep.subr.mxu0 %v259_v36  ;;  %v383_v41 = vld [vmem:[#allocation2 + $0x6c8] sm:$0xff]  ;;  %v254_v42 = vld [vmem:[#allocation2 + $0x2c0] sm:$0xff]  ;;  %563 = vmatprep.subr.mxu1 %v387_v37 }
  0x41   :  { %493 = vmatpush2.msra.mxu0 %v258_v38  ;;  %v382_v43 = vld [vmem:[#allocation2 + $0x6c0] sm:$0xff]  ;;  %v251_v44 = vld [vmem:[#allocation2 + $0x2a8] sm:$0xff]  ;;  %564 = vmatpush2.msra.mxu1 %v386_v39 }
  0x42   :  { %494 = vmatprep.subr.mxu0 %v255_v40  ;;  %v379_v45 = vld [vmem:[#allocation2 + $0x6a8] sm:$0xff]  ;;  %v250_v46 = vld [vmem:[#allocation2 + $0x2a0] sm:$0xff]  ;;  %565 = vmatprep.subr.mxu1 %v383_v41 }
  0x43   :  { %495 = vmatpush2.msra.mxu0 %v254_v42  ;;  %v378_v47 = vld [vmem:[#allocation2 + $0x6a0] sm:$0xff]  ;;  %v247_v48 = vld [vmem:[#allocation2 + $0x288] sm:$0xff]  ;;  %566 = vmatpush2.msra.mxu1 %v382_v43 }
  0x44   :  { %496 = vmatprep.subr.mxu0 %v251_v44  ;;  %v375_v49 = vld [vmem:[#allocation2 + $0x688] sm:$0xff]  ;;  %v246_v50 = vld [vmem:[#allocation2 + $0x280] sm:$0xff]  ;;  %567 = vmatprep.subr.mxu1 %v379_v45 }
  0x45   :  { %497 = vmatpush2.msra.mxu0 %v250_v46  ;;  %v374_v51 = vld [vmem:[#allocation2 + $0x680] sm:$0xff]  ;;  %v243_v52 = vld [vmem:[#allocation2 + $0x268] sm:$0xff]  ;;  %568 = vmatpush2.msra.mxu1 %v378_v47 }
  0x46   :  { %498 = vmatprep.subr.mxu0 %v247_v48  ;;  %v371_v53 = vld [vmem:[#allocation2 + $0x668] sm:$0xff]  ;;  %v242_v54 = vld [vmem:[#allocation2 + $0x260] sm:$0xff]  ;;  %569 = vmatprep.subr.mxu1 %v375_v49 }
  0x47   :  { %499 = vmatpush2.msra.mxu0 %v246_v50  ;;  %v370_v55 = vld [vmem:[#allocation2 + $0x660] sm:$0xff]  ;;  %v239_v56 = vld [vmem:[#allocation2 + $0x248] sm:$0xff]  ;;  %570 = vmatpush2.msra.mxu1 %v374_v51 }
  0x48   :  { %500 = vmatprep.subr.mxu0 %v243_v52  ;;  %v367_v57 = vld [vmem:[#allocation2 + $0x648] sm:$0xff]  ;;  %v238_v58 = vld [vmem:[#allocation2 + $0x240] sm:$0xff]  ;;  %571 = vmatprep.subr.mxu1 %v371_v53 }
  0x49   :  { %501 = vmatpush2.msra.mxu0 %v242_v54  ;;  %v366_v59 = vld [vmem:[#allocation2 + $0x640] sm:$0xff]  ;;  %v235_v60 = vld [vmem:[#allocation2 + $0x228] sm:$0xff]  ;;  %572 = vmatpush2.msra.mxu1 %v370_v55 }
  0x4a   :  { %502 = vmatprep.subr.mxu0 %v239_v56  ;;  %v363_v61 = vld [vmem:[#allocation2 + $0x628] sm:$0xff]  ;;  %v234_v62 = vld [vmem:[#allocation2 + $0x220] sm:$0xff]  ;;  %573 = vmatprep.subr.mxu1 %v367_v57 }
  0x4b   :  { %503 = vmatpush2.msra.mxu0 %v238_v58  ;;  %v362_v63 = vld [vmem:[#allocation2 + $0x620] sm:$0xff]  ;;  %v231_v1 = vld [vmem:[#allocation2 + $0x208] sm:$0xff]  ;;  %574 = vmatpush2.msra.mxu1 %v366_v59 }
  0x4c   :  { %504 = vmatprep.subr.mxu0 %v235_v60  ;;  %v359_v2 = vld [vmem:[#allocation2 + $0x608] sm:$0xff]  ;;  %v230_v3 = vld [vmem:[#allocation2 + $0x200] sm:$0xff]  ;;  %575 = vmatprep.subr.mxu1 %v363_v61  ;;  %v228_v60 = vld [vmem:[#allocation2 + $0x1f0] sm:$0xff] }
  0x4d   :  { %505 = vmatpush2.msra.mxu0 %v234_v62  ;;  %v358_v4 = vld [vmem:[#allocation2 + $0x600] sm:$0xff]  ;;  %576 = vmatpush2.msra.mxu1 %v362_v63  ;;  %v356_v61 = vld [vmem:[#allocation2 + $0x5f0] sm:$0xff]  ;;  %v225_v62 = vld [vmem:[#allocation2 + $0x1d8] sm:$0xff] }
  0x4e   :  { %506 = vmatprep.subr.mxu0 %v231_v1  ;;  %577 = vmatprep.subr.mxu1 %v359_v2  ;;  %v41_v13 = vld [vmem:[%s1393_s1] sm:$0xff]  ;;  %v353_v63 = vld [vmem:[#allocation2 + $0x5d8] sm:$0xff]  ;;  %v224_v1 = vld [vmem:[#allocation2 + $0x1d0] sm:$0xff] }
  0x4f   :  { %507 = vmatpush2.msra.mxu0 %v230_v3  ;;  %578 = vmatpush2.msra.mxu1 %v358_v4  ;;  %v55_v18 = vrot.slane %v41_v13, %v1145_v10  ;;  %v59_v19 = vrot.slane %v41_v13, %v58_v11  ;;  %v63_v20 = vrot.slane %v41_v13, %v62_v12  ;;  %v136_v30 = vld [vmem:[%s1394_s2] sm:$0xf]  ;;  %v352_v2 = vld [vmem:[#allocation2 + $0x5d0] sm:$0xff]  ;;  %v221_v3 = vld [vmem:[#allocation2 + $0x1b8] sm:$0xff] }
  0x50   :  { %586 = vmatprep.subr.mxu0 %v229_v5  ;;  %657 = vmatprep.subr.mxu1 %v357_v6  ;;  %v95_v21 = vrot.slane %v41_v13, %v1150_v14  ;;  %v99_v22 = vrot.slane %v41_v13, %v1152_v15  ;;  %v103_v23 = vrot.slane %v41_v13, %v102_v16  ;;  %v349_v4 = vld [vmem:[#allocation2 + $0x5b8] sm:$0xff]  ;;  %v220_v5 = vld [vmem:[#allocation2 + $0x1b0] sm:$0xff] }
  0x51   :  { %1059 = vset.pattern.permute.xlu0 %v1091_v0  ;;  %v51_v0 = vrot.slane %v41_v13, %v1143_v9  ;;  %v107_v24 = vrot.slane %v41_v13, %v106_v17  ;;  %v75_v27 = vrot.slane %v55_v18, %v1143_v9  ;;  %v79_v28 = vrot.slane %v59_v19, %v1143_v9  ;;  %v348_v6 = vld [vmem:[#allocation2 + $0x5b0] sm:$0xff]  ;;  %v213_v13 = vld [vmem:[#allocation2 + $0x178] sm:$0xff] }
  0x52   :  { %v83_v29 = vrot.slane %v63_v20, %v1143_v9  ;;  %v115_v31 = vrot.slane %v95_v21, %v1150_v14  ;;  %v119_v32 = vrot.slane %v99_v22, %v1150_v14  ;;  %v123_v33 = vrot.slane %v103_v23, %v1150_v14  ;;  %v216_v11 = vld [vmem:[#allocation2 + $0x190] sm:$0xff]  ;;  %v341_v16 = vld [vmem:[#allocation2 + $0x578] sm:$0xff] }
  0x53   :  { %v71_v26 = vrot.slane %v51_v0, %v1143_v9  ;;  %v127_v34 = vrot.slane %v107_v24, %v1150_v14  ;;  %v145_v35 = vrot.slane %v136_v30, %v1150_v14  ;;  %v153_v36 = vrot.slane %v136_v30, %v1152_v15  ;;  %v344_v12 = vld [vmem:[#allocation2 + $0x590] sm:$0xff]  ;;  %v209_v18 = vld [vmem:[#allocation2 + $0x158] sm:$0xff] }
  0x54   :  { %v141_v37 = vrot.slane %v136_v30, %v1143_v9  ;;  %v149_v38 = vrot.slane %v136_v30, %v1145_v10  ;;  %v212_v17 = vld [vmem:[#allocation2 + $0x170] sm:$0xff]  ;;  %v337_v19 = vld [vmem:[#allocation2 + $0x558] sm:$0xff] }
  0x55   :  { %v340_v0 = vld [vmem:[#allocation2 + $0x570] sm:$0xff]  ;;  %v205_v22 = vld [vmem:[#allocation2 + $0x138] sm:$0xff] }
  0x56   :  { %v208_v20 = vld [vmem:[#allocation2 + $0x150] sm:$0xff]  ;;  %v333_v23 = vld [vmem:[#allocation2 + $0x538] sm:$0xff] }
  0x57   :  { %v336_v21 = vld [vmem:[#allocation2 + $0x550] sm:$0xff]  ;;  %v197_v30 = vld [vmem:[#allocation2 + $0xf8] sm:$0xff] }
  0x58   :  { %v204_v24 = vld [vmem:[#allocation2 + $0x130] sm:$0xff] }
  0x8a   :  { %v45_v25 = vpop.permute.xlu0 %44 }
  0x8b   :  { %v84_v39 = vmul.f32 %v71_v26, %v45_v25  ;;  %v85_v40 = vmul.f32 %v75_v27, %v45_v25  ;;  %v86_v41 = vmul.f32 %v79_v28, %v45_v25  ;;  %v87_v42 = vmul.f32 %v83_v29, %v45_v25  ;;  %v332_v25 = vld [vmem:[#allocation2 + $0x530] sm:$0xff]  ;;  %v201_v26 = vld [vmem:[#allocation2 + $0x118] sm:$0xff] }
  0x8c   :  { %v329_v27 = vld [vmem:[#allocation2 + $0x518] sm:$0xff]  ;;  %v200_v28 = vld [vmem:[#allocation2 + $0x110] sm:$0xff] }
  0x8d   :  { %v328_v29 = vld [vmem:[#allocation2 + $0x510] sm:$0xff] }
  0x8f   :  { %v90_v43 = vpop.permute.xlu0 %89 }
  0x90   :  { %v128_v44 = vmul.f32 %v115_v31, %v90_v43  ;;  %v129_v45 = vmul.f32 %v119_v32, %v90_v43  ;;  %v130_v46 = vmul.f32 %v123_v33, %v90_v43  ;;  %v131_v47 = vmul.f32 %v127_v34, %v90_v43  ;;  %v325_v31 = vld [vmem:[#allocation2 + $0x4f8] sm:$0xff]  ;;  %v196_v32 = vld [vmem:[#allocation2 + $0xf0] sm:$0xff] }
  0x91   :  { %v324_v33 = vld [vmem:[#allocation2 + $0x4f0] sm:$0xff]  ;;  %v193_v34 = vld [vmem:[#allocation2 + $0xd8] sm:$0xff] }
  0x92   :  { %v133_v48 = vadd.f32 %v129_v45, %v85_v40  ;;  %v135_v49 = vadd.f32 %v131_v47, %v87_v42  ;;  %v132_v50 = vadd.f32 %v128_v44, %v84_v39  ;;  %v134_v51 = vadd.f32 %v130_v46, %v86_v41  ;;  %v317_v39 = vld [vmem:[#allocation2 + $0x4b8] sm:$0xff]  ;;  %v188_v40 = vld [vmem:[#allocation2 + $0xb0] sm:$0xff] }
  0x93   :  { %v316_v41 = vld [vmem:[#allocation2 + $0x4b0] sm:$0xff]  ;;  %v185_v42 = vld [vmem:[#allocation2 + $0x98] sm:$0xff] }
  0x94   :  { %v159_v52 = vadd.f32 %v145_v35, %v133_v48  ;;  %v161_v53 = vadd.f32 %v153_v36, %v135_v49  ;;  %v1173_v54 = vadd.f32 %v141_v37, %v132_v50  ;;  %v1175_v55 = vadd.f32 %v149_v38, %v134_v51  ;;  %v321_v35 = vld [vmem:[#allocation2 + $0x4d8] sm:$0xff]  ;;  %v192_v36 = vld [vmem:[#allocation2 + $0xd0] sm:$0xff] }
  0x95   :  { %v320_v37 = vld [vmem:[#allocation2 + $0x4d0] sm:$0xff]  ;;  %v189_v38 = vld [vmem:[#allocation2 + $0xb8] sm:$0xff] }
  0x96   :  { %v163_v56 = vmax.f32 %v159_v52, 0.0  ;;  %v165_v57 = vmax.f32 %v161_v53, 0.0  ;;  %v162_v58 = vmax.f32 %v1173_v54, 0.0  ;;  %v164_v59 = vmax.f32 %v1175_v55, 0.0  ;;  %v313_v43 = vld [vmem:[#allocation2 + $0x498] sm:$0xff]  ;;  %v184_v44 = vld [vmem:[#allocation2 + $0x90] sm:$0xff] }
  0x97   :  { %v312_v45 = vld [vmem:[#allocation2 + $0x490] sm:$0xff]  ;;  %v181_v46 = vld [vmem:[#allocation2 + $0x78] sm:$0xff]  ;;  %v745_v54 = vld [vmem:[%s1397_s5 + $0x68] sm:$0xff] }
  0x98   :  { %508 = vmatprep.mubr.f32.mxu0 %v163_v56  ;;  %579 = vmatprep.mubr.f32.mxu1 %v165_v57  ;;  %v309_v47 = vld [vmem:[#allocation2 + $0x478] sm:$0xff]  ;;  %v180_v48 = vld [vmem:[#allocation2 + $0x70] sm:$0xff]  ;;  %v760_v55 = vld [vmem:[%s1397_s5 + $0xe0] sm:$0xff] }
  0x99   :  { %509 = vmatmul.mubr.f32.vlgmr.msra.gmra.mxu0 %v162_v58  ;;  %580 = vmatmul.mubr.f32.vlgmr.msra.gmra.mxu1 %v164_v59  ;;  %v308_v49 = vld [vmem:[#allocation2 + $0x470] sm:$0xff]  ;;  %v177_v50 = vld [vmem:[#allocation2 + $0x58] sm:$0xff] }
  0x9a   :  { %587 = vmatpush1.msra.mxu0 %v228_v60  ;;  %658 = vmatpush1.msra.mxu1 %v356_v61  ;;  %v305_v51 = vld [vmem:[#allocation2 + $0x458] sm:$0xff]  ;;  %v176_v52 = vld [vmem:[#allocation2 + $0x50] sm:$0xff] }
  0x9b   :  { %588 = vmatprep.subr.mxu0 %v225_v62  ;;  %650 = vmatprep.mubr.f32.mxu0 %v163_v56  ;;  %v304_v53 = vld [vmem:[#allocation2 + $0x450] sm:$0xff]  ;;  %v173_v56 = vld [vmem:[#allocation2 + $0x38] sm:$0xff] }
  0x9c   :  { %659 = vmatprep.subr.mxu1 %v353_v63  ;;  %721 = vmatprep.mubr.f32.mxu1 %v165_v57  ;;  %v301_v57 = vld [vmem:[#allocation2 + $0x438] sm:$0xff]  ;;  %v172_v60 = vld [vmem:[#allocation2 + $0x30] sm:$0xff] }
  0x9d   :  { %589 = vmatpush1.msra.mxu0 %v224_v1  ;;  %660 = vmatpush1.msra.mxu1 %v352_v2  ;;  %v300_v61 = vld [vmem:[#allocation2 + $0x430] sm:$0xff]  ;;  %v169_v62 = vld [vmem:[#allocation2 + $0x18] sm:$0xff] }
  0x9e   :  { %590 = vmatprep.subr.mxu0 %v221_v3  ;;  %661 = vmatprep.subr.mxu1 %v349_v4  ;;  %v297_v63 = vld [vmem:[#allocation2 + $0x418] sm:$0xff]  ;;  %v168_v1 = vld [vmem:[#allocation2 + $0x10] sm:$0xff] }
  0x9f   :  { %591 = vmatpush1.msra.mxu0 %v220_v5  ;;  %662 = vmatpush1.msra.mxu1 %v348_v6  ;;  %v296_v2 = vld [vmem:[#allocation2 + $0x410] sm:$0xff]  ;;  %v293_v3 = vld [vmem:[#allocation2 + $0x3f8] sm:$0xff] }
  0xa0   :  { %592 = vmatprep.subr.mxu0 %v217_v7  ;;  %663 = vmatprep.subr.mxu1 %v345_v8  ;;  %v421_v4 = vld [vmem:[#allocation2 + $0x7f8] sm:$0xff]  ;;  %v292_v5 = vld [vmem:[#allocation2 + $0x3f0] sm:$0xff] }
  0xa1   :  { %593 = vmatpush1.msra.mxu0 %v216_v11  ;;  %664 = vmatpush1.msra.mxu1 %v344_v12  ;;  %v420_v6 = vld [vmem:[#allocation2 + $0x7f0] sm:$0xff]  ;;  %v289_v7 = vld [vmem:[#allocation2 + $0x3d8] sm:$0xff] }
  0xa2   :  { %594 = vmatprep.subr.mxu0 %v213_v13  ;;  %665 = vmatprep.subr.mxu1 %v341_v16  ;;  %v417_v8 = vld [vmem:[#allocation2 + $0x7d8] sm:$0xff]  ;;  %v288_v11 = vld [vmem:[#allocation2 + $0x3d0] sm:$0xff] }
  0xa3   :  { %595 = vmatpush1.msra.mxu0 %v212_v17  ;;  %666 = vmatpush1.msra.mxu1 %v340_v0  ;;  %v416_v12 = vld [vmem:[#allocation2 + $0x7d0] sm:$0xff]  ;;  %v285_v13 = vld [vmem:[#allocation2 + $0x3b8] sm:$0xff] }
  0xa4   :  { %596 = vmatprep.subr.mxu0 %v209_v18  ;;  %667 = vmatprep.subr.mxu1 %v337_v19  ;;  %v413_v16 = vld [vmem:[#allocation2 + $0x7b8] sm:$0xff]  ;;  %v284_v17 = vld [vmem:[#allocation2 + $0x3b0] sm:$0xff] }
  0xa5   :  { %597 = vmatpush1.msra.mxu0 %v208_v20  ;;  %668 = vmatpush1.msra.mxu1 %v336_v21  ;;  %v412_v0 = vld [vmem:[#allocation2 + $0x7b0] sm:$0xff]  ;;  %v281_v18 = vld [vmem:[#allocation2 + $0x398] sm:$0xff] }
  0xa6   :  { %598 = vmatprep.subr.mxu0 %v205_v22  ;;  %669 = vmatprep.subr.mxu1 %v333_v23  ;;  %v409_v19 = vld [vmem:[#allocation2 + $0x798] sm:$0xff]  ;;  %v280_v20 = vld [vmem:[#allocation2 + $0x390] sm:$0xff] }
  0xa7   :  { %599 = vmatpush1.msra.mxu0 %v204_v24  ;;  %670 = vmatpush1.msra.mxu1 %v332_v25  ;;  %v408_v21 = vld [vmem:[#allocation2 + $0x790] sm:$0xff]  ;;  %v277_v22 = vld [vmem:[#allocation2 + $0x378] sm:$0xff] }
  0xa8   :  { %600 = vmatprep.subr.mxu0 %v201_v26  ;;  %671 = vmatprep.subr.mxu1 %v329_v27  ;;  %v405_v23 = vld [vmem:[#allocation2 + $0x778] sm:$0xff]  ;;  %v276_v24 = vld [vmem:[#allocation2 + $0x370] sm:$0xff] }
  0xa9   :  { %601 = vmatpush1.msra.mxu0 %v200_v28  ;;  %672 = vmatpush1.msra.mxu1 %v328_v29  ;;  %v404_v25 = vld [vmem:[#allocation2 + $0x770] sm:$0xff]  ;;  %v273_v26 = vld [vmem:[#allocation2 + $0x358] sm:$0xff] }
  0xaa   :  { %602 = vmatprep.subr.mxu0 %v197_v30  ;;  %673 = vmatprep.subr.mxu1 %v325_v31  ;;  %v401_v27 = vld [vmem:[#allocation2 + $0x758] sm:$0xff]  ;;  %v272_v28 = vld [vmem:[#allocation2 + $0x350] sm:$0xff] }
  0xab   :  { %603 = vmatpush1.msra.mxu0 %v196_v32  ;;  %674 = vmatpush1.msra.mxu1 %v324_v33  ;;  %v400_v29 = vld [vmem:[#allocation2 + $0x750] sm:$0xff]  ;;  %v269_v30 = vld [vmem:[#allocation2 + $0x338] sm:$0xff] }
  0xac   :  { %604 = vmatprep.subr.mxu0 %v193_v34  ;;  %675 = vmatprep.subr.mxu1 %v321_v35  ;;  %v397_v31 = vld [vmem:[#allocation2 + $0x738] sm:$0xff]  ;;  %v268_v32 = vld [vmem:[#allocation2 + $0x330] sm:$0xff] }
  0xad   :  { %605 = vmatpush1.msra.mxu0 %v192_v36  ;;  %676 = vmatpush1.msra.mxu1 %v320_v37  ;;  %v396_v33 = vld [vmem:[#allocation2 + $0x730] sm:$0xff]  ;;  %v265_v34 = vld [vmem:[#allocation2 + $0x318] sm:$0xff] }
  0xae   :  { %606 = vmatprep.subr.mxu0 %v189_v38  ;;  %677 = vmatprep.subr.mxu1 %v317_v39  ;;  %v393_v35 = vld [vmem:[#allocation2 + $0x718] sm:$0xff]  ;;  %v264_v36 = vld [vmem:[#allocation2 + $0x310] sm:$0xff] }
  0xaf   :  { %607 = vmatpush1.msra.mxu0 %v188_v40  ;;  %678 = vmatpush1.msra.mxu1 %v316_v41  ;;  %v392_v37 = vld [vmem:[#allocation2 + $0x710] sm:$0xff]  ;;  %v261_v38 = vld [vmem:[#allocation2 + $0x2f8] sm:$0xff] }
  0xb0   :  { %608 = vmatprep.subr.mxu0 %v185_v42  ;;  %679 = vmatprep.subr.mxu1 %v313_v43  ;;  %v389_v39 = vld [vmem:[#allocation2 + $0x6f8] sm:$0xff]  ;;  %v260_v40 = vld [vmem:[#allocation2 + $0x2f0] sm:$0xff] }
  0xb1   :  { %609 = vmatpush1.msra.mxu0 %v184_v44  ;;  %680 = vmatpush1.msra.mxu1 %v312_v45  ;;  %v388_v41 = vld [vmem:[#allocation2 + $0x6f0] sm:$0xff]  ;;  %v257_v42 = vld [vmem:[#allocation2 + $0x2d8] sm:$0xff] }
  0xb2   :  { %610 = vmatprep.subr.mxu0 %v181_v46  ;;  %681 = vmatprep.subr.mxu1 %v309_v47  ;;  %v385_v43 = vld [vmem:[#allocation2 + $0x6d8] sm:$0xff]  ;;  %v256_v44 = vld [vmem:[#allocation2 + $0x2d0] sm:$0xff] }
  0xb3   :  { %611 = vmatpush1.msra.mxu0 %v180_v48  ;;  %682 = vmatpush1.msra.mxu1 %v308_v49  ;;  %v384_v45 = vld [vmem:[#allocation2 + $0x6d0] sm:$0xff]  ;;  %v253_v46 = vld [vmem:[#allocation2 + $0x2b8] sm:$0xff] }
  0xb4   :  { %612 = vmatprep.subr.mxu0 %v177_v50  ;;  %683 = vmatprep.subr.mxu1 %v305_v51  ;;  %v381_v47 = vld [vmem:[#allocation2 + $0x6b8] sm:$0xff]  ;;  %v252_v48 = vld [vmem:[#allocation2 + $0x2b0] sm:$0xff] }
  0xb5   :  { %613 = vmatpush1.msra.mxu0 %v176_v52  ;;  %684 = vmatpush1.msra.mxu1 %v304_v53  ;;  %v380_v49 = vld [vmem:[#allocation2 + $0x6b0] sm:$0xff]  ;;  %v249_v50 = vld [vmem:[#allocation2 + $0x298] sm:$0xff] }
  0xb6   :  { %614 = vmatprep.subr.mxu0 %v173_v56  ;;  %685 = vmatprep.subr.mxu1 %v301_v57  ;;  %v377_v51 = vld [vmem:[#allocation2 + $0x698] sm:$0xff]  ;;  %v248_v52 = vld [vmem:[#allocation2 + $0x290] sm:$0xff] }
  0xb7   :  { %615 = vmatpush1.msra.mxu0 %v172_v60  ;;  %686 = vmatpush1.msra.mxu1 %v300_v61  ;;  %v376_v53 = vld [vmem:[#allocation2 + $0x690] sm:$0xff]  ;;  %v245_v56 = vld [vmem:[#allocation2 + $0x278] sm:$0xff] }
  0xb8   :  { %616 = vmatprep.subr.mxu0 %v169_v62  ;;  %687 = vmatprep.subr.mxu1 %v297_v63  ;;  %v373_v57 = vld [vmem:[#allocation2 + $0x678] sm:$0xff]  ;;  %v244_v60 = vld [vmem:[#allocation2 + $0x270] sm:$0xff] }
  0xb9   :  { %617 = vmatpush1.msra.mxu0 %v168_v1  ;;  %688 = vmatpush1.msra.mxu1 %v296_v2  ;;  %v372_v61 = vld [vmem:[#allocation2 + $0x670] sm:$0xff]  ;;  %v241_v62 = vld [vmem:[#allocation2 + $0x258] sm:$0xff] }
  0xba   :  { %618 = vmatprep.subr.mxu0 %v293_v3  ;;  %689 = vmatprep.subr.mxu1 %v421_v4  ;;  %v369_v63 = vld [vmem:[#allocation2 + $0x658] sm:$0xff]  ;;  %v240_v1 = vld [vmem:[#allocation2 + $0x250] sm:$0xff] }
  0xbb   :  { %619 = vmatpush2.msra.mxu0 %v292_v5  ;;  %690 = vmatpush2.msra.mxu1 %v420_v6  ;;  %v368_v2 = vld [vmem:[#allocation2 + $0x650] sm:$0xff]  ;;  %v237_v3 = vld [vmem:[#allocation2 + $0x238] sm:$0xff] }
  0xbc   :  { %620 = vmatprep.subr.mxu0 %v289_v7  ;;  %691 = vmatprep.subr.mxu1 %v417_v8  ;;  %v365_v4 = vld [vmem:[#allocation2 + $0x638] sm:$0xff]  ;;  %v236_v5 = vld [vmem:[#allocation2 + $0x230] sm:$0xff] }
  0xbd   :  { %621 = vmatpush2.msra.mxu0 %v288_v11  ;;  %692 = vmatpush2.msra.mxu1 %v416_v12  ;;  %v364_v6 = vld [vmem:[#allocation2 + $0x630] sm:$0xff]  ;;  %v233_v7 = vld [vmem:[#allocation2 + $0x218] sm:$0xff] }
  0xbe   :  { %622 = vmatprep.subr.mxu0 %v285_v13  ;;  %693 = vmatprep.subr.mxu1 %v413_v16  ;;  %v361_v8 = vld [vmem:[#allocation2 + $0x618] sm:$0xff]  ;;  %v232_v11 = vld [vmem:[#allocation2 + $0x210] sm:$0xff] }
  0xbf   :  { %623 = vmatpush2.msra.mxu0 %v284_v17  ;;  %694 = vmatpush2.msra.mxu1 %v412_v0  ;;  %v360_v12 = vld [vmem:[#allocation2 + $0x610] sm:$0xff]  ;;  %v763_v13 = vld [vmem:[%s1397_s5 + $0xf8] sm:$0xff] }
  0xc0   :  { %624 = vmatprep.subr.mxu0 %v281_v18  ;;  %695 = vmatprep.subr.mxu1 %v409_v19  ;;  %v747_v16 = vld [vmem:[%s1397_s5 + $0x78] sm:$0xff]  ;;  %v762_v17 = vld [vmem:[%s1397_s5 + $0xf0] sm:$0xff]  ;;  %v761_v18 = vld [vmem:[%s1397_s5 + $0xe8] sm:$0xff] }
  0xc1   :  { %625 = vmatpush2.msra.mxu0 %v280_v20  ;;  %696 = vmatpush2.msra.mxu1 %v408_v21  ;;  %v746_v0 = vld [vmem:[%s1397_s5 + $0x70] sm:$0xff]  ;;  %v743_v19 = vld [vmem:[%s1397_s5 + $0x58] sm:$0xff] }
  0xc2   :  { %626 = vmatprep.subr.mxu0 %v277_v22  ;;  %697 = vmatprep.subr.mxu1 %v405_v23  ;;  %v758_v20 = vld [vmem:[%s1397_s5 + $0xd0] sm:$0xff]  ;;  %v795_v22 = vld [vmem:[%s1397_s5 + $0x1f8] sm:$0xff] }
  0xc3   :  { %627 = vmatpush2.msra.mxu0 %v276_v24  ;;  %698 = vmatpush2.msra.mxu1 %v404_v25  ;;  %v742_v21 = vld [vmem:[%s1397_s5 + $0x50] sm:$0xff]  ;;  %v779_v23 = vld [vmem:[%s1397_s5 + $0x178] sm:$0xff]  ;;  %v757_v25 = vld [vmem:[%s1397_s5 + $0xc8] sm:$0xff] }
  0xc4   :  { %628 = vmatprep.subr.mxu0 %v273_v26  ;;  %699 = vmatprep.subr.mxu1 %v401_v27  ;;  %v794_v24 = vld [vmem:[%s1397_s5 + $0x1f0] sm:$0xff]  ;;  %v741_v27 = vld [vmem:[%s1397_s5 + $0x48] sm:$0xff] }
  0xc5   :  { %629 = vmatpush2.msra.mxu0 %v272_v28  ;;  %700 = vmatpush2.msra.mxu1 %v400_v29  ;;  %v778_v26 = vld [vmem:[%s1397_s5 + $0x170] sm:$0xff]  ;;  %v793_v28 = vld [vmem:[%s1397_s5 + $0x1e8] sm:$0xff]  ;;  %v756_v29 = vld [vmem:[%s1397_s5 + $0xc0] sm:$0xff] }
  0xc6   :  { %630 = vmatprep.subr.mxu0 %v269_v30  ;;  %701 = vmatprep.subr.mxu1 %v397_v31  ;;  %v777_v30 = vld [vmem:[%s1397_s5 + $0x168] sm:$0xff]  ;;  %v740_v31 = vld [vmem:[%s1397_s5 + $0x40] sm:$0xff] }
  0xc7   :  { %631 = vmatpush2.msra.mxu0 %v268_v32  ;;  %702 = vmatpush2.msra.mxu1 %v396_v33  ;;  %v792_v32 = vld [vmem:[%s1397_s5 + $0x1e0] sm:$0xff]  ;;  %v755_v33 = vld [vmem:[%s1397_s5 + $0xb8] sm:$0xff] }
  0xc8   :  { %632 = vmatprep.subr.mxu0 %v265_v34  ;;  %703 = vmatprep.subr.mxu1 %v393_v35  ;;  %v776_v34 = vld [vmem:[%s1397_s5 + $0x160] sm:$0xff]  ;;  %v739_v35 = vld [vmem:[%s1397_s5 + $0x38] sm:$0xff] }
  0xc9   :  { %633 = vmatpush2.msra.mxu0 %v264_v36  ;;  %704 = vmatpush2.msra.mxu1 %v392_v37  ;;  %v791_v36 = vld [vmem:[%s1397_s5 + $0x1d8] sm:$0xff]  ;;  %v754_v37 = vld [vmem:[%s1397_s5 + $0xb0] sm:$0xff] }
  0xca   :  { %634 = vmatprep.subr.mxu0 %v261_v38  ;;  %705 = vmatprep.subr.mxu1 %v389_v39  ;;  %v775_v38 = vld [vmem:[%s1397_s5 + $0x158] sm:$0xff]  ;;  %v738_v39 = vld [vmem:[%s1397_s5 + $0x30] sm:$0xff] }
  0xcb   :  { %635 = vmatpush2.msra.mxu0 %v260_v40  ;;  %706 = vmatpush2.msra.mxu1 %v388_v41  ;;  %v790_v40 = vld [vmem:[%s1397_s5 + $0x1d0] sm:$0xff]  ;;  %v753_v41 = vld [vmem:[%s1397_s5 + $0xa8] sm:$0xff] }
  0xcc   :  { %636 = vmatprep.subr.mxu0 %v257_v42  ;;  %707 = vmatprep.subr.mxu1 %v385_v43  ;;  %v774_v42 = vld [vmem:[%s1397_s5 + $0x150] sm:$0xff]  ;;  %v737_v43 = vld [vmem:[%s1397_s5 + $0x28] sm:$0xff] }
  0xcd   :  { %637 = vmatpush2.msra.mxu0 %v256_v44  ;;  %708 = vmatpush2.msra.mxu1 %v384_v45  ;;  %v789_v44 = vld [vmem:[%s1397_s5 + $0x1c8] sm:$0xff]  ;;  %v752_v45 = vld [vmem:[%s1397_s5 + $0xa0] sm:$0xff] }
  0xce   :  { %638 = vmatprep.subr.mxu0 %v253_v46  ;;  %709 = vmatprep.subr.mxu1 %v381_v47  ;;  %v773_v46 = vld [vmem:[%s1397_s5 + $0x148] sm:$0xff]  ;;  %v736_v47 = vld [vmem:[%s1397_s5 + $0x20] sm:$0xff] }
  0xcf   :  { %639 = vmatpush2.msra.mxu0 %v252_v48  ;;  %710 = vmatpush2.msra.mxu1 %v380_v49  ;;  %v788_v48 = vld [vmem:[%s1397_s5 + $0x1c0] sm:$0xff]  ;;  %v751_v49 = vld [vmem:[%s1397_s5 + $0x98] sm:$0xff] }
  0xd0   :  { %640 = vmatprep.subr.mxu0 %v249_v50  ;;  %711 = vmatprep.subr.mxu1 %v377_v51  ;;  %v772_v50 = vld [vmem:[%s1397_s5 + $0x140] sm:$0xff]  ;;  %v735_v51 = vld [vmem:[%s1397_s5 + $0x18] sm:$0xff] }
  0xd1   :  { %641 = vmatpush2.msra.mxu0 %v248_v52  ;;  %712 = vmatpush2.msra.mxu1 %v376_v53  ;;  %v787_v52 = vld [vmem:[%s1397_s5 + $0x1b8] sm:$0xff]  ;;  %v750_v53 = vld [vmem:[%s1397_s5 + $0x90] sm:$0xff] }
  0xd2   :  { %642 = vmatprep.subr.mxu0 %v245_v56  ;;  %713 = vmatprep.subr.mxu1 %v373_v57  ;;  %v771_v56 = vld [vmem:[%s1397_s5 + $0x138] sm:$0xff]  ;;  %v734_v57 = vld [vmem:[%s1397_s5 + $0x10] sm:$0xff] }
  0xd3   :  { %643 = vmatpush2.msra.mxu0 %v244_v60  ;;  %714 = vmatpush2.msra.mxu1 %v372_v61  ;;  %v786_v60 = vld [vmem:[%s1397_s5 + $0x1b0] sm:$0xff]  ;;  %v749_v61 = vld [vmem:[%s1397_s5 + $0x88] sm:$0xff] }
  0xd4   :  { %644 = vmatprep.subr.mxu0 %v241_v62  ;;  %715 = vmatprep.subr.mxu1 %v369_v63  ;;  %v770_v62 = vld [vmem:[%s1397_s5 + $0x130] sm:$0xff]  ;;  %v733_v63 = vld [vmem:[%s1397_s5 + $0x8] sm:$0xff] }
  0xd5   :  { %645 = vmatpush2.msra.mxu0 %v240_v1  ;;  %716 = vmatpush2.msra.mxu1 %v368_v2  ;;  %v785_v1 = vld [vmem:[%s1397_s5 + $0x1a8] sm:$0xff]  ;;  %v748_v2 = vld [vmem:[%s1397_s5 + $0x80] sm:$0xff] }
  0xd6   :  { %646 = vmatprep.subr.mxu0 %v237_v3  ;;  %717 = vmatprep.subr.mxu1 %v365_v4  ;;  %v769_v3 = vld [vmem:[%s1397_s5 + $0x128] sm:$0xff]  ;;  %v732_v4 = vld [vmem:[%s1397_s5] sm:$0xff] }
  0xd7   :  { %647 = vmatpush2.msra.mxu0 %v236_v5  ;;  %718 = vmatpush2.msra.mxu1 %v364_v6  ;;  %v784_v5 = vld [vmem:[%s1397_s5 + $0x1a0] sm:$0xff] }
  0xd8   :  { %648 = vmatprep.subr.mxu0 %v233_v7  ;;  %719 = vmatprep.subr.mxu1 %v361_v8  ;;  %v768_v6 = vld [vmem:[%s1397_s5 + $0x120] sm:$0xff]  ;;  %v783_v7 = vld [vmem:[%s1397_s5 + $0x198] sm:$0xff] }
  0xd9   :  { %649 = vmatpush2.msra.mxu0 %v232_v11  ;;  %720 = vmatpush2.msra.mxu1 %v360_v12  ;;  %v767_v8 = vld [vmem:[%s1397_s5 + $0x118] sm:$0xff]  ;;  %v782_v11 = vld [vmem:[%s1397_s5 + $0x190] sm:$0xff] }
  0xda   :  { %651 = vmatmul.mubr.f32.vlgmr.msra.gmra.mxu0 %v162_v58  ;;  %722 = vmatmul.mubr.f32.vlgmr.msra.gmra.mxu1 %v164_v59  ;;  %v744_v58 = vld [vmem:[%s1397_s5 + $0x60] sm:$0xff]  ;;  %v759_v59 = vld [vmem:[%s1397_s5 + $0xd8] sm:$0xff]  ;;  %v766_v12 = vld [vmem:[%s1397_s5 + $0x110] sm:$0xff] }
  0xdb   :  { %980 = vmatprep.subr.mxu0 %v763_v13  ;;  %1015 = vmatprep.subr.mxu1 %v795_v22  ;;  %v781_v13 = vld [vmem:[%s1397_s5 + $0x188] sm:$0xff] }
  0xdc   :  { %981 = vmatpush3.msra.mxu0 %v747_v16  ;;  %1016 = vmatpush3.msra.mxu1 %v779_v23  ;;  %v765_v16 = vld [vmem:[%s1397_s5 + $0x108] sm:$0xff] }
  0xdd   :  { %982 = vmatprep.subr.mxu0 %v762_v17  ;;  %1017 = vmatprep.subr.mxu1 %v794_v24  ;;  %v780_v17 = vld [vmem:[%s1397_s5 + $0x180] sm:$0xff] }
  0xde   :  { %983 = vmatpush3.msra.mxu0 %v746_v0  ;;  %1018 = vmatpush3.msra.mxu1 %v778_v26  ;;  %v764_v0 = vld [vmem:[%s1397_s5 + $0x100] sm:$0xff] }
  0xdf   :  { %984 = vmatprep.subr.mxu0 %v761_v18  ;;  %1019 = vmatprep.subr.mxu1 %v793_v28  ;;  %v422_v18 = vld [vmem:[%s1396_s4] sm:$0xf] }
  0xe0   :  { %985 = vmatpush3.msra.mxu0 %v745_v54  ;;  %1020 = vmatpush3.msra.mxu1 %v777_v30  ;;  %v427_v54 = vrot.slane %v422_v18, %v1143_v9  ;;  %v439_v28 = vrot.slane %v422_v18, %v1152_v15 }
  0xe1   :  { %986 = vmatprep.subr.mxu0 %v760_v55  ;;  %1021 = vmatprep.subr.mxu1 %v792_v32  ;;  %v431_v55 = vrot.slane %v422_v18, %v1150_v14 }
  0xe2   :  { %987 = vmatpush3.msra.mxu0 %v744_v58  ;;  %1022 = vmatpush3.msra.mxu1 %v776_v34 }
  0xe3   :  { %988 = vmatprep.subr.mxu0 %v759_v59  ;;  %1023 = vmatprep.subr.mxu1 %v791_v36 }
  0xe4   :  { %989 = vmatpush3.msra.mxu0 %v743_v19  ;;  %1024 = vmatpush3.msra.mxu1 %v775_v38 }
  0xe5   :  { %990 = vmatprep.subr.mxu0 %v758_v20  ;;  %1025 = vmatprep.subr.mxu1 %v790_v40 }
  0xe6   :  { %991 = vmatpush3.msra.mxu0 %v742_v21  ;;  %1026 = vmatpush3.msra.mxu1 %v774_v42 }
  0xe7   :  { %992 = vmatprep.subr.mxu0 %v757_v25  ;;  %1027 = vmatprep.subr.mxu1 %v789_v44 }
  0xe8   :  { %993 = vmatpush3.msra.mxu0 %v741_v27  ;;  %1028 = vmatpush3.msra.mxu1 %v773_v46  ;;  %v435_v27 = vrot.slane %v422_v18, %v1145_v10  ;;  %v979_v10 = vld [vmem:[%s1398_s6] ss:$0 sm:$0xff] }
  0xe9   :  { %994 = vmatprep.subr.mxu0 %v756_v29  ;;  %1029 = vmatprep.subr.mxu1 %v788_v48 }
  0xea   :  { %995 = vmatpush3.msra.mxu0 %v740_v31  ;;  %1030 = vmatpush3.msra.mxu1 %v772_v50 }
  0xeb   :  { %996 = vmatprep.subr.mxu0 %v755_v33  ;;  %1031 = vmatprep.subr.mxu1 %v787_v52 }
  0xec   :  { %997 = vmatpush3.msra.mxu0 %v739_v35  ;;  %1032 = vmatpush3.msra.mxu1 %v771_v56 }
  0xed   :  { %998 = vmatprep.subr.mxu0 %v754_v37  ;;  %1033 = vmatprep.subr.mxu1 %v786_v60 }
  0xee   :  { %999 = vmatpush3.msra.mxu0 %v738_v39  ;;  %1034 = vmatpush3.msra.mxu1 %v770_v62 }
  0xef   :  { %1000 = vmatprep.subr.mxu0 %v753_v41  ;;  %1035 = vmatprep.subr.mxu1 %v785_v1 }
  0xf0   :  { %1001 = vmatpush3.msra.mxu0 %v737_v43  ;;  %1036 = vmatpush3.msra.mxu1 %v769_v3 }
  0xf1   :  { %1002 = vmatprep.subr.mxu0 %v752_v45  ;;  %1037 = vmatprep.subr.mxu1 %v784_v5 }
  0xf2   :  { %1003 = vmatpush3.msra.mxu0 %v736_v47  ;;  %1038 = vmatpush3.msra.mxu1 %v768_v6 }
  0xf3   :  { %1004 = vmatprep.subr.mxu0 %v751_v49  ;;  %1039 = vmatprep.subr.mxu1 %v783_v7 }
  0xf4   :  { %1005 = vmatpush3.msra.mxu0 %v735_v51  ;;  %1040 = vmatpush3.msra.mxu1 %v767_v8 }
  0xf5   :  { %1006 = vmatprep.subr.mxu0 %v750_v53  ;;  %1041 = vmatprep.subr.mxu1 %v782_v11 }
  0xf6   :  { %1007 = vmatpush3.msra.mxu0 %v734_v57  ;;  %1042 = vmatpush3.msra.mxu1 %v766_v12 }
  0xf7   :  { %1008 = vmatprep.subr.mxu0 %v749_v61  ;;  %1043 = vmatprep.subr.mxu1 %v781_v13 }
  0xf8   :  { %1009 = vmatpush3.msra.mxu0 %v733_v63  ;;  %1044 = vmatpush3.msra.mxu1 %v765_v16 }
  0xf9   :  { %1010 = vmatprep.subr.mxu0 %v748_v2  ;;  %1045 = vmatprep.subr.mxu1 %v780_v17 }
  0xfa   :  { %1011 = vmatpush3.msra.mxu0 %v732_v4  ;;  %1046 = vmatpush3.msra.mxu1 %v764_v0 }
 0x159   :  { %v510_v58 = vpop.f32.mrf.mxu0  ;;  %v581_v59 = vpop.f32.mrf.mxu1 }
 0x15a   :  { %v511_v19 = vadd.f32 %v510_v58, %v427_v54 }
 0x15b   :  { %v512_v20 = vpop.f32.mrf.mxu0  ;;  %v583_v23 = vpop.f32.mrf.mxu1 }
 0x15c   :  { %v513_v21 = vadd.f32 %v512_v20, %v431_v55  ;;  %v582_v22 = vadd.f32 %v581_v59, %v511_v19 }
 0x15e   :  { %v584_v24 = vadd.f32 %v583_v23, %v513_v21  ;;  %v728_v26 = vmax.f32 %v582_v22, 0.0 }
 0x160   :  { %v729_v25 = vmax.f32 %v584_v24, 0.0 }
 0x162   :  { %867 = vmatprep.mubr.f32.mxu0 %v729_v25 }
 0x163   :  { %868 = vmatmul.mubr.f32.vlgmr.msra.gmra.mxu0 %v728_v26 }
 0x19a   :  { %v652_v29 = vpop.f32.mrf.mxu0  ;;  %v723_v9 = vpop.f32.mrf.mxu1 }
 0x19b   :  { %v653_v30 = vadd.f32 %v652_v29, %v435_v27 }
 0x19c   :  { %v654_v14 = vpop.f32.mrf.mxu0  ;;  %v725_v33 = vpop.f32.mrf.mxu1 }
 0x19d   :  { %v655_v31 = vadd.f32 %v654_v14, %v439_v28  ;;  %v724_v32 = vadd.f32 %v723_v9, %v653_v30 }
 0x19f   :  { %v726_v34 = vadd.f32 %v725_v33, %v655_v31  ;;  %v730_v36 = vmax.f32 %v724_v32, 0.0 }
 0x1a1   :  { %v731_v35 = vmax.f32 %v726_v34, 0.0 }
 0x1a3   :  { %937 = vmatprep.mubr.f32.mxu1 %v731_v35 }
 0x1a4   :  { %938 = vmatmul.mubr.f32.vlgmr.msra.gmra.mxu1 %v730_v36 }
 0x223   :  { %v1012_v37 = vpop.f32.mrf.mxu0 }
 0x225   :  { %v1013_v38 = vpop.f32.mrf.mxu0 }
 0x226   :  { %v1014_v39 = vadd.f32 %v1013_v38, %v1012_v37 }
 0x228   :  { %v870_v41 = vadd.f32 %v1014_v39, %v979_v10 }
 0x264   :  { %v1047_v15 = vpop.f32.mrf.mxu1 }
 0x266   :  { %v1048_v40 = vpop.f32.mrf.mxu1 }
 0x267   :  { %v1049_v42 = vadd.f32 %v1048_v40, %v1047_v15 }
 0x269   :  { %v940_v43 = vadd.f32 %v1049_v42, %v870_v41 }
 0x26b   :  { %944 = vrot.lane.b32.xlu1 %v940_v43, %s1093_s9 }
 0x2dd   :  { %v945_v44 = vpop.permute.xlu1 %944 }
 0x2de   :  { %v947_v45 = vmax.f32 %v940_v43, %v945_v44 }
 0x2e0   :  { %952 = vrot.lane.b32.xlu1 %v947_v45, %s1094_s0  ;;  %v948_v50 = vsub.f32 %v940_v43, %v947_v45 }
 0x2e2   :  { %v949_v51 = vmul.f32 1.442695, %v948_v50 }
 0x352   :  { %v953_v46 = vpop.permute.xlu1 %952 }
 0x353   :  { %v955_v47 = vsub.f32 %v940_v43, %v953_v46 }
 0x355   :  { %v956_v48 = vmul.f32 1.442695, %v955_v47 }
 0x357   :  { %1060 = vpow2.f32 %v956_v48 }
 0x358   :  { %1062 = vpow2.f32 %v949_v51 }
 0x364   :  { %v1061_v49 = vpop.eup %1060 }
 0x365   :  { %959 = vrot.lane.b32.xlu1 %v1061_v49, %s1093_s9  ;;  %v1063_v52 = vpop.eup %1062 }
 0x3d7   :  { %v960_v53 = vpop.permute.xlu1 %959 }
 0x3d8   :  { %v962_v56 = vadd.f32 %v1063_v52, %v960_v53 }
 0x3da   :  { %1064 = vlog2.f32 %v962_v56 }
 0x3e7   :  { %v1065_v57 = vpop.eup %1064 }
 0x3e8   :  { %v964_v60 = vmul.f32 0.6931472, %v1065_v57 }
 0x3ea   :  { %v965_v61 = vadd.f32 %v964_v60, %v947_v45 }
 0x3ec   :  { %968 = vperm.xlu0 %1059, %v965_v61  }
 0x467   :  { %v969_v62 = vpop.permute.xlu0 %968 }
 0x468   :  { %v971_v63 = vsub.f32 %v940_v43, %v969_v62 }
 0x46a   :  { %973 = vst.msk [vmem:[%s1399_s7] sm:$0xff] %vm972_vm0, %v971_v63 }
 0x46b   :  { %978 = vsyncpa [#allocation3], 1 }

</bundles_post_ra>
